<compile_context>
chip_gen: v5e
topology: v5e:2x2
jax: 0.10.0
libtpu: 0.0.40
codegen_flags: <defaults>
</compile_context>

<pallas_src>
import functools
import math

import jax
import jax.numpy as jnp
from jax.experimental import pallas as pl
from jax.experimental.pallas import tpu as pltpu

_LANE = 128                       # lane granularity
_MAX_TC = 1024                    # column-tile cap (keeps several col tiles for megacore)
_TARGET_TILE_BYTES = 2 * 1024 * 1024   # per-input block; v5e scoped-VMEM safe
_BYPASS_ELEMS = 1 << 20           # below this, fused XLA elementwise+reduce wins


def _round_up(x, m):
    return ((x + m - 1) // m) * m


def _round_down(x, m):
    return (x // m) * m


def _cdiv(a, b):
    return (a + b - 1) // b


def _pick_tiles(bs, seq_len):
    """Adaptive (TR, TC): TC multiple of 128, TR multiple of 8, ~2 MiB/block."""
    tc = min(_round_up(seq_len, _LANE), _MAX_TC)
    rows_target = max(_TARGET_TILE_BYTES // (tc * 4), 8)
    tr = min(max(_round_down(rows_target, 8), 8), _round_up(bs, 8))
    return tr, tc


def _mse_partial_kernel(t_ref, p_ref, o_ref, *, tr, tc, bs, seq_len,
                        rows_ragged, cols_ragged):
    j = pl.program_id(0)   # column tile (outer, "parallel" -> split across TCs on v7x)
    i = pl.program_id(1)   # row tile    (inner, "arbitrary" reduction axis)

    # The output block (0, j) is resident across the whole inner sweep and
    # doubles as the accumulator: zero it on the first inner step.
    @pl.when(i == 0)
    def _init():
        o_ref[...] = jnp.zeros_like(o_ref)

    # Steady state: VPU-only (cast, sub, mul, sublane-group adds).
    t = t_ref[...].astype(jnp.float32)
    p = p_ref[...].astype(jnp.float32)
    d = t - p
    d2 = d * d

    def _accumulate(x):
        # (TR, TC) -> (8, TC): sum groups of 8 sublanes.  The reshape is a
        # no-op relayout (minor dim unchanged) and the sum is plain vreg adds.
        o_ref[...] += x.reshape(tr // 8, 8, tc).sum(axis=0)

    if not (rows_ragged or cols_ragged):
        # Shapes divide the tiles exactly: no masking code is emitted at all.
        _accumulate(d2)
    else:
        conds = []
        if rows_ragged:
            conds.append(i == pl.num_programs(1) - 1)
        if cols_ragged:
            conds.append(j == pl.num_programs(0) - 1)
        edge = conds[0] if len(conds) == 1 else jnp.logical_or(conds[0], conds[1])

        @pl.when(edge)
        def _edge_tile():
            valid = None
            if rows_ragged:
                rows = i * tr + jax.lax.broadcasted_iota(jnp.int32, (tr, tc), 0)
                valid = rows < bs
            if cols_ragged:
                cols = j * tc + jax.lax.broadcasted_iota(jnp.int32, (tr, tc), 1)
                cvalid = cols < seq_len
                valid = cvalid if valid is None else jnp.logical_and(valid, cvalid)
            # where (not multiply): OOB padding may be NaN/Inf; select 0 exactly.
            _accumulate(jnp.where(valid, d2, 0.0))

        @pl.when(jnp.logical_not(edge))
        def _interior_tile():
            _accumulate(d2)


def duration_loss(true, pred, *, force_kernel=False):
    """Scalar f32 MSE; semantics of nn.MSELoss()(true.float(), pred)."""
    assert true.shape == pred.shape
    n = math.prod(true.shape)

    if true.ndim != 2 or (n < _BYPASS_ELEMS and not force_kernel):
        # Tiny inputs (or non-(bs, seq_len) shapes): fused XLA op is cheaper.
        return jnp.mean((true.astype(jnp.float32) - pred.astype(jnp.float32)) ** 2)

    bs, seq_len = true.shape
    tr, tc = _pick_tiles(bs, seq_len)
    n_row_tiles = _cdiv(bs, tr)
    n_col_tiles = _cdiv(seq_len, tc)
    rows_ragged = (bs % tr) != 0
    cols_ragged = (seq_len % tc) != 0

    kernel = functools.partial(
        _mse_partial_kernel, tr=tr, tc=tc, bs=bs, seq_len=seq_len,
        rows_ragged=rows_ragged, cols_ragged=cols_ragged)

    # Per-column-tile partial sums, shape (8, TC) each; final (tiny) reduce and
    # the 1/n scale happen in the wrapper.  No host-side pad/reshape copies.
    partials = pl.pallas_call(
        kernel,
        out_shape=jax.ShapeDtypeStruct((8, tc * n_col_tiles), jnp.float32),
        grid_spec=pltpu.PrefetchScalarGridSpec(
            num_scalar_prefetch=0,
            grid=(n_col_tiles, n_row_tiles),
            in_specs=[
                pl.BlockSpec((tr, tc), lambda j, i: (i, j)),
                pl.BlockSpec((tr, tc), lambda j, i: (i, j)),
            ],
            out_specs=pl.BlockSpec((8, tc), lambda j, i: (0, j)),
        ),
        compiler_params=pltpu.CompilerParams(
            # Column tiles are independent (per-tile partials) -> parallel;
            # row tiles accumulate into the resident output block -> arbitrary.
            dimension_semantics=("parallel", "arbitrary"),
        ),
    )(true, pred)

    return jnp.sum(partials) * (1.0 / n)


if __name__ == "__main__":
    key = jax.random.PRNGKey(0)
    k1, k2, k3, k4, k5, k6 = jax.random.split(key, 6)

    def ref_loss(t, p):
        return jnp.mean((t.astype(jnp.float32) - p.astype(jnp.float32)) ** 2)

    # (1) Small (bs, seq_len) matching the module docstring; force the kernel
    #     path (single tile, both dims smaller than the block -> fully masked).
    bs, seq_len = 2, 8
    true_small = jax.random.randint(k1, (bs, seq_len), 0, 10, dtype=jnp.int32)
    pred_small = jax.random.normal(k2, (bs, seq_len), dtype=jnp.float32) * 3.0 + 5.0
    loss_small = duration_loss(true_small, pred_small, force_kernel=True)
    jax.block_until_ready(loss_small)
    ref_small = ref_loss(true_small, pred_small)
    assert jnp.allclose(loss_small, ref_small, rtol=1e-5, atol=1e-5), (
        loss_small, ref_small)

    # (2) Tile-aligned shape: exercises the pure-VPU interior (no-mask) path.
    true_a = jax.random.randint(k3, (8, 1024), 0, 30, dtype=jnp.int32)
    pred_a = jax.random.normal(k4, (8, 1024), dtype=jnp.float32) * 5.0 + 10.0
    loss_a = duration_loss(true_a, pred_a, force_kernel=True)
    jax.block_until_ready(loss_a)
    ref_a = ref_loss(true_a, pred_a)
    assert jnp.allclose(loss_a, ref_a, rtol=1e-4, atol=1e-4), (loss_a, ref_a)

    # (3) Ragged rows AND columns + multiple column tiles: exercises the
    #     in-kernel edge masking and the multi-partial reduction.
    true_b = jax.random.randint(k5, (50, 3000), 0, 30, dtype=jnp.int32)
    pred_b = jax.random.normal(k6, (50, 3000), dtype=jnp.float32) * 5.0 + 10.0
    loss_b = duration_loss(true_b, pred_b, force_kernel=True)
    jax.block_until_ready(loss_b)
    ref_b = ref_loss(true_b, pred_b)
    assert jnp.allclose(loss_b, ref_b, rtol=1e-4, atol=1e-4), (loss_b, ref_b)

    print("KERNEL_OK")
</pallas_src>

<mosaic_0001>
module attributes {stable_mosaic.version = 11 : i64} {
  func.func @_mse_partial_kernel(%arg0: i32, %arg1: i32, %arg2: memref<8x128xi32, #tpu.memory_space<vmem>>, %arg3: memref<8x128xf32, #tpu.memory_space<vmem>>, %arg4: memref<8x128xf32, #tpu.memory_space<vmem>>) attributes {dimension_semantics = [#tpu.dimension_semantics<parallel>, #tpu.dimension_semantics<arbitrary>], iteration_bounds = array<i64: 1, 1>, scalar_prefetch = 0 : i64, scratch_operands = 0 : i64, tpu.core_type = #tpu.core_type<tc>, window_params = [{transform_indices = @transform_0, window_bounds = array<i64: 8, 128>}, {transform_indices = @transform_1, window_bounds = array<i64: 8, 128>}, {transform_indices = @transform_2, window_bounds = array<i64: 8, 128>}]} {
    %c0_i32 = arith.constant 0 : i32
    %0 = arith.cmpi eq, %arg1, %c0_i32 : i32
    %1 = arith.extui %0 : i1 to i32
    %c0_i32_0 = arith.constant 0 : i32
    %2 = arith.cmpi ne, %1, %c0_i32_0 : i32
    scf.if %2 {
      %cst = arith.constant 0.000000e+00 : f32
      %16 = vector.broadcast %cst : f32 to vector<8x128xf32>
      %c0_8 = arith.constant 0 : index
      %c0_9 = arith.constant 0 : index
      %17 = vector.load %arg4[%c0_8, %c0_9] : memref<8x128xf32, #tpu.memory_space<vmem>>, vector<8x128xf32>
      tpu.vector_store %arg4[%c0_8, %c0_9], %16 {strides = array<i32>} : memref<8x128xf32, #tpu.memory_space<vmem>>, vector<8x128xf32>,
    } else {
    }
    %c0 = arith.constant 0 : index
    %c0_1 = arith.constant 0 : index
    %3 = vector.load %arg2[%c0, %c0_1] : memref<8x128xi32, #tpu.memory_space<vmem>>, vector<8x128xi32>
    %4 = arith.sitofp %3 : vector<8x128xi32> to vector<8x128xf32>
    %c0_2 = arith.constant 0 : index
    %c0_3 = arith.constant 0 : index
    %5 = vector.load %arg3[%c0_2, %c0_3] : memref<8x128xf32, #tpu.memory_space<vmem>>, vector<8x128xf32>
    %6 = arith.subf %4, %5 : vector<8x128xf32>
    %7 = arith.mulf %6, %6 : vector<8x128xf32>
    %c0_i32_4 = arith.constant 0 : i32
    %8 = arith.cmpi eq, %arg1, %c0_i32_4 : i32
    %c0_i32_5 = arith.constant 0 : i32
    %9 = arith.cmpi eq, %arg0, %c0_i32_5 : i32
    %10 = arith.ori %8, %9 : i1
    %11 = arith.extui %10 : i1 to i32
    %c0_i32_6 = arith.constant 0 : i32
    %12 = arith.cmpi ne, %11, %c0_i32_6 : i32
    scf.if %12 {
      %c8_i32 = arith.constant 8 : i32
      %16 = arith.muli %arg1, %c8_i32 : i32
      %17 = tpu.iota {dimensions = array<i32: 0>} : vector<8x128xi32>
      %18 = vector.broadcast %16 : i32 to vector<8x128xi32>
      %19 = arith.addi %18, %17 : vector<8x128xi32>
      %c2_i32 = arith.constant 2 : i32
      %20 = vector.broadcast %c2_i32 : i32 to vector<8x128xi32>
      %21 = arith.cmpi slt, %19, %20 : vector<8x128xi32>
      %c128_i32 = arith.constant 128 : i32
      %22 = arith.muli %arg0, %c128_i32 : i32
      %23 = tpu.iota {dimensions = array<i32: 1>} : vector<8x128xi32>
      %24 = vector.broadcast %22 : i32 to vector<8x128xi32>
      %25 = arith.addi %24, %23 : vector<8x128xi32>
      %c8_i32_8 = arith.constant 8 : i32
      %26 = vector.broadcast %c8_i32_8 : i32 to vector<8x128xi32>
      %27 = arith.cmpi slt, %25, %26 : vector<8x128xi32>
      %28 = arith.andi %21, %27 : vector<8x128xi1>
      %cst = arith.constant 0.000000e+00 : f32
      %29 = vector.broadcast %cst : f32 to vector<8x128xf32>
      %30 = arith.select %28, %7, %29 : vector<8x128xi1>, vector<8x128xf32>
      %c0_9 = arith.constant 0 : index
      %c0_10 = arith.constant 0 : index
      %31 = vector.load %arg4[%c0_9, %c0_10] : memref<8x128xf32, #tpu.memory_space<vmem>>, vector<8x128xf32>
      %32 = vector.shape_cast %30 : vector<8x128xf32> to vector<1x8x128xf32>
      %cst_11 = arith.constant dense<0.000000e+00> : vector<8x128xf32>
      %33 = vector.multi_reduction <add>, %32, %cst_11 [0] : vector<1x8x128xf32> to vector<8x128xf32>
      %34 = arith.addf %31, %33 : vector<8x128xf32>
      %c0_12 = arith.constant 0 : index
      %c0_13 = arith.constant 0 : index
      %35 = vector.load %arg4[%c0_12, %c0_13] : memref<8x128xf32, #tpu.memory_space<vmem>>, vector<8x128xf32>
      tpu.vector_store %arg4[%c0_12, %c0_13], %34 {strides = array<i32>} : memref<8x128xf32, #tpu.memory_space<vmem>>, vector<8x128xf32>,
    } else {
    }
    %true = arith.constant true
    %13 = arith.xori %10, %true : i1
    %14 = arith.extui %13 : i1 to i32
    %c0_i32_7 = arith.constant 0 : i32
    %15 = arith.cmpi ne, %14, %c0_i32_7 : i32
    scf.if %15 {
      %c0_8 = arith.constant 0 : index
      %c0_9 = arith.constant 0 : index
      %16 = vector.load %arg4[%c0_8, %c0_9] : memref<8x128xf32, #tpu.memory_space<vmem>>, vector<8x128xf32>
      %17 = vector.shape_cast %7 : vector<8x128xf32> to vector<1x8x128xf32>
      %cst = arith.constant dense<0.000000e+00> : vector<8x128xf32>
      %18 = vector.multi_reduction <add>, %17, %cst [0] : vector<1x8x128xf32> to vector<8x128xf32>
      %19 = arith.addf %16, %18 : vector<8x128xf32>
      %c0_10 = arith.constant 0 : index
      %c0_11 = arith.constant 0 : index
      %20 = vector.load %arg4[%c0_10, %c0_11] : memref<8x128xf32, #tpu.memory_space<vmem>>, vector<8x128xf32>
      tpu.vector_store %arg4[%c0_10, %c0_11], %19 {strides = array<i32>} : memref<8x128xf32, #tpu.memory_space<vmem>>, vector<8x128xf32>,
    } else {
    }
    return
  }
  func.func @transform_0(%arg0: i32, %arg1: i32) -> (i32, i32) {
    %c0_i32 = arith.constant 0 : i32
    return %arg1, %arg0 : i32, i32
  }
  func.func @transform_1(%arg0: i32, %arg1: i32) -> (i32, i32) {
    %c0_i32 = arith.constant 0 : i32
    return %arg1, %arg0 : i32, i32
  }
  func.func @transform_2(%arg0: i32, %arg1: i32) -> (i32, i32) {
    %c0_i32 = arith.constant 0 : i32
    %c0_i32_0 = arith.constant 0 : i32
    return %c0_i32, %arg0 : i32, i32
  }
}

</mosaic_0001>

<bundles_post_ra>
// kernel: tpu_custom_call.1
= control target key start
LH: loop header
LB: loop body
LE: loop exit
PB: predicated region body
PF: predicated region fallthrough
CT: control target
= control target key end

     0   :  { %7 = vsyncpa [#allocation3], 0  ;;  %s215_s0 = inlined_call_operand.hbm [shape: s32[2,8], index: 0, kind: input, shape index: {}]   ;;  %s216_s1 = inlined_call_operand.hbm [shape: f32[2,8], index: 1, kind: input, shape index: {}]   ;;  %s217_s2 = inlined_call_operand.hbm [shape: f32[8,128], index: 2, kind: output, shape index: {}]  }
   0x1   :  { %8 = vsyncpa [#allocation6], 0 }
   0x2   :  { %9 = vsyncpa [#allocation4], 0 }
   0x3   :  { %13 = vsyncadd [#allocation3], 96  ;;  %s14_s11 = sshll.u32 %s215_s0, 4  ;;  %s186_s12 = smov [#allocation2]   ;;  %s15_s11 = int_to_ptr.hbm [resolvable:$true] %s14_s11 }
   0x4   :  { %s16_s13 = sshll.u32 %s186_s12, 4  ;;  %s187_s14 = smov 32   ;;  %s17_s13 = int_to_ptr.vmem [resolvable:$true] %s16_s13 }
   0x5   :  { %s188_s15 = smov 2  }
   0x6   :  { %22 = dma.hbm_to_vmem [thread:$0]  %s15_s11, 32, %s17_s13, [#allocation3], %s187_s14, %s187_s14, %s188_s15  }
   0x7   :  { %26 = vsyncadd [#allocation6], 96  ;;  %s27_s18 = sshll.u32 %s216_s1, 4  ;;  %s189_s19 = smov [#allocation5]   ;;  %s28_s18 = int_to_ptr.hbm [resolvable:$true] %s27_s18 }
   0x8   :  { %s29_s20 = sshll.u32 %s189_s19, 4  ;;  %s30_s20 = int_to_ptr.vmem [resolvable:$true] %s29_s20 }
   0x9   :  { %35 = dma.hbm_to_vmem [thread:$0]  %s28_s18, 32, %s30_s20, [#allocation6], %s187_s14, %s187_s14, %s188_s15  }
   0xa   :  { %180 = dma.done.wait [#allocation3], 128  }
   0xb   :  { %181 = vsyncadd [#allocation3], 4294967168 }
   0xc   :  { %182 = dma.done.wait [#allocation6], 128  }
   0xd   :  { %183 = vsyncadd [#allocation6], 4294967168  ;;  %v60_v0 = vlaneseq  ;;  %v49_v3 = vld [vmem:[#allocation2] sm:$0xff]  ;;  %v51_v4 = vld [vmem:[#allocation5] sm:$0xff]  ;;  %s190_s0 = smov [#allocation7]   ;;  %s91_s23 = sshll.u32 %s217_s2, 4  ;;  %s92_s23 = int_to_ptr.hbm [resolvable:$true] %s91_s23 }
   0xe   :  { %v50_v5 = vcvt.s32.f32 %v49_v3  ;;  %s89_s1 = sshll.u32 %s190_s0, 4  ;;  %s90_s1 = int_to_ptr.vmem [resolvable:$true] %s89_s1 }
   0xf   :  { %v61_v1 = vshrl.u32 %v60_v0, 7  ;;  %v67_v2 = vand.u32 127, %v60_v0 }
  0x10   :  { %v52_v6 = vsub.f32 %v50_v5, %v51_v4 }
  0x11   :  { %vm64_vm0 = vcmp.lt.s32.totalorder %v61_v1, 2  ;;  %vm70_vm1 = vcmp.lt.s32.totalorder %v67_v2, 8 }
  0x12   :  { %vm71_vm2 = vmand %vm64_vm0, %vm70_vm1  ;;  %v53_v7 = vmul.f32 %v52_v6, %v52_v6 }
  0x14   :  { %v72_v8 = vsel %vm71_vm2, %v53_v7, 0.0 }
  0x15   :  { %76 = vst [vmem:[#allocation7] sm:$0xff] %v72_v8 }
  0x16   :  { %94 = dma.vmem_to_hbm [thread:$0]  %s90_s1, 128, %s92_s23, [#allocation4]  }
  0x17   :  { %184 = dma.done.wait [#allocation4], 128  }
  0x18   :  { %185 = vsyncadd [#allocation4], 4294967168 }
  0x19   :  { %99 = vsyncpa [#allocation3], 1 }
  0x1a   :  { %100 = vsyncpa [#allocation6], 1 }
  0x1b   :  { %101 = vsyncpa [#allocation4], 1 }

</bundles_post_ra>
